<compile_context>
chip_gen: v7x
topology: tpu7x:2x2x1
jax: 0.10.0
libtpu: 0.0.40
codegen_flags: <defaults>
</compile_context>

<pallas_src>
import jax
import jax.numpy as jnp
from jax.experimental import pallas as pl
from jax.experimental.pallas import tpu as pltpu

LN_EPS = 1e-5  # torch.nn.LayerNorm default


def conv_layernorm_kernel(x_ref, o_ref):
    # block: (C, TL) -- leading batch dim is squeezed out by the BlockSpec.
    x = x_ref[...].astype(jnp.float32)
    # One read pass: mean and E[x^2] together (sublane reductions -> XLU).
    mean = jnp.mean(x, axis=0, keepdims=True)
    mean_sq = jnp.mean(x * x, axis=0, keepdims=True)
    # Biased variance (torch LayerNorm); clamp tiny negative cancellation.
    var = jnp.maximum(mean_sq - mean * mean, 0.0)
    inv_std = jax.lax.rsqrt(var + LN_EPS)          # EUP (free slot)
    shift = -mean * inv_std                        # (1, TL) broadcast, cheap
    # One fused normalize pass, no materialized `centered` temp.
    o_ref[...] = (x * inv_std + shift).astype(o_ref.dtype)


def conv_layer_norm(x, *, tl_target=None, vmem_limit_bytes=None):
    """x: (B, C, L). LayerNorm over C applied per (b, l); NCL in, NCL out."""
    B, C, L = x.shape
    itemsize = jnp.dtype(x.dtype).itemsize

    # --- Generation-aware VMEM budget --------------------------------------
    try:
        vmem_cap = pltpu.get_tpu_info().vmem_capacity_bytes
    except Exception:
        vmem_cap = 64 * 1024 * 1024  # conservative (v7x per-TC size)

    if vmem_cap >= 96 * 1024 * 1024:
        # v5e / v6e: 128 MiB VMEM -> keep tiles (and DMA rows) long.
        io_budget = 56 * 1024 * 1024
        default_vmem_limit = 100 * 1024 * 1024
    else:
        # v7x: 64 MiB per TC -> leave headroom for f32 temps + pipeliner.
        io_budget = 16 * 1024 * 1024
        default_vmem_limit = 48 * 1024 * 1024
    if vmem_limit_bytes is None:
        vmem_limit_bytes = default_vmem_limit

    # --- Tile-size selection ------------------------------------------------
    if tl_target is None:
        # Real per-column footprint: double-buffered input + output
        # (2 bufs x 2 arrays x itemsize) plus ~3 f32 in-kernel temporaries.
        bytes_per_col = C * (4 * itemsize + 3 * 4)
        max_tl = io_budget // max(bytes_per_col, 1)
        tl_target = max(128, min(2048, (max_tl // 128) * 128))

    # Lane-dense tile: always a multiple of 128, never wider than needed.
    TL = min(tl_target, 128 * pl.cdiv(L, 128))
    TL = max(128, (TL // 128) * 128)

    # Give the pipeline / both TensorCores something to overlap: aim for
    # >= 8 total grid steps when L allows (a few slightly smaller tiles are
    # free for a bandwidth-bound kernel).
    while TL > 128 and B * pl.cdiv(L, TL) < 8:
        new_tl = max(128, ((TL // 2 + 127) // 128) * 128)
        if new_tl >= TL:
            break
        TL = new_tl

    num_l_blocks = pl.cdiv(L, TL)

    # NOTE: with small per-tile bytes, pipeline_mode=pl.Buffered(3) on the
    # input spec is a cheap extra experiment; left at the default (2) here.
    out = pl.pallas_call(
        conv_layernorm_kernel,
        out_shape=jax.ShapeDtypeStruct((B, C, L), x.dtype),
        grid_spec=pltpu.PrefetchScalarGridSpec(
            num_scalar_prefetch=0,
            grid=(B, num_l_blocks),
            in_specs=[pl.BlockSpec((None, C, TL), lambda b, l: (b, 0, l))],
            out_specs=pl.BlockSpec((None, C, TL), lambda b, l: (b, 0, l)),
        ),
        compiler_params=pltpu.CompilerParams(
            dimension_semantics=("parallel", "parallel"),
            vmem_limit_bytes=vmem_limit_bytes,
        ),
    )(x)
    return out


def conv_layer_norm_ref(x):
    # pure-JAX reference replicating the PyTorch forward
    xt = jnp.transpose(x, (0, 2, 1)).astype(jnp.float32)   # (B, L, C)
    mean = jnp.mean(xt, axis=-1, keepdims=True)
    var = jnp.mean((xt - mean) ** 2, axis=-1, keepdims=True)
    y = (xt - mean) / jnp.sqrt(var + LN_EPS)
    return jnp.transpose(y, (0, 2, 1)).astype(x.dtype)      # (B, C, L)


if __name__ == "__main__":
    key = jax.random.PRNGKey(0)

    # Small shape matching the module's forward (no learnable params).
    B, C, L = 2, 4, 16
    x = jax.random.normal(key, (B, C, L), dtype=jnp.float32)
    out = jax.block_until_ready(conv_layer_norm(x))
    ref = conv_layer_norm_ref(x)
    assert out.shape == (B, C, L)
    assert jnp.allclose(out, ref, atol=1e-4, rtol=1e-4), "mismatch vs reference"

    # Exercise the ragged final L-block (cdiv grid + masked tail stores).
    B2, C2, L2 = 2, 8, 300
    x2 = jax.random.normal(jax.random.PRNGKey(1), (B2, C2, L2), dtype=jnp.float32)
    out2 = jax.block_until_ready(conv_layer_norm(x2, tl_target=128))
    ref2 = conv_layer_norm_ref(x2)
    assert out2.shape == (B2, C2, L2)
    assert jnp.allclose(out2, ref2, atol=1e-4, rtol=1e-4), "mismatch (ragged path)"

    print("KERNEL_OK")
</pallas_src>

<mosaic_0001>
module attributes {stable_mosaic.version = 11 : i64} {
  func.func @conv_layernorm_kernel(%arg0: i32, %arg1: i32, %arg2: memref<1x4x128xf32, #tpu.memory_space<vmem>>, %arg3: memref<1x4x128xf32, #tpu.memory_space<vmem>>) attributes {dimension_semantics = [#tpu.dimension_semantics<parallel>, #tpu.dimension_semantics<parallel>], iteration_bounds = array<i64: 2, 1>, scalar_prefetch = 0 : i64, scratch_operands = 0 : i64, tpu.core_type = #tpu.core_type<tc>, window_params = [{transform_indices = @transform_0, window_bounds = array<i64: 1, 4, 128>}, {transform_indices = @transform_1, window_bounds = array<i64: 1, 4, 128>}]} {
    %c0 = arith.constant 0 : index
    %c0_0 = arith.constant 0 : index
    %c0_1 = arith.constant 0 : index
    %0 = vector.load %arg2[%c0, %c0_0, %c0_1] : memref<1x4x128xf32, #tpu.memory_space<vmem>>, vector<1x4x128xf32>
    %1 = vector.shape_cast %0 : vector<1x4x128xf32> to vector<4x128xf32>
    %cst = arith.constant dense<0.000000e+00> : vector<128xf32>
    %2 = vector.multi_reduction <add>, %1, %cst [0] : vector<4x128xf32> to vector<128xf32>
    %3 = vector.shape_cast %2 : vector<128xf32> to vector<1x128xf32>
    %cst_2 = arith.constant 4.000000e+00 : f32
    %4 = vector.broadcast %cst_2 : f32 to vector<1x128xf32>
    %5 = arith.divf %3, %4 : vector<1x128xf32>
    %6 = arith.mulf %1, %1 : vector<4x128xf32>
    %cst_3 = arith.constant dense<0.000000e+00> : vector<128xf32>
    %7 = vector.multi_reduction <add>, %6, %cst_3 [0] : vector<4x128xf32> to vector<128xf32>
    %8 = vector.shape_cast %7 : vector<128xf32> to vector<1x128xf32>
    %cst_4 = arith.constant 4.000000e+00 : f32
    %9 = vector.broadcast %cst_4 : f32 to vector<1x128xf32>
    %10 = arith.divf %8, %9 : vector<1x128xf32>
    %11 = arith.mulf %5, %5 : vector<1x128xf32>
    %12 = arith.subf %10, %11 : vector<1x128xf32>
    %cst_5 = arith.constant 0.000000e+00 : f32
    %13 = vector.broadcast %cst_5 : f32 to vector<1x128xf32>
    %14 = arith.maximumf %12, %13 : vector<1x128xf32>
    %cst_6 = arith.constant 9.99999974E-6 : f32
    %15 = vector.broadcast %cst_6 : f32 to vector<1x128xf32>
    %16 = arith.addf %14, %15 : vector<1x128xf32>
    %17 = math.rsqrt %16 : vector<1x128xf32>
    %cst_7 = arith.constant 0.000000e+00 : f32
    %18 = vector.broadcast %cst_7 : f32 to vector<1x128xf32>
    %19 = arith.subf %18, %5 : vector<1x128xf32>
    %20 = arith.mulf %19, %17 : vector<1x128xf32>
    %21 = vector.broadcast %17 : vector<1x128xf32> to vector<4x128xf32>
    %22 = arith.mulf %1, %21 : vector<4x128xf32>
    %23 = vector.broadcast %20 : vector<1x128xf32> to vector<4x128xf32>
    %24 = arith.addf %22, %23 : vector<4x128xf32>
    %c0_8 = arith.constant 0 : index
    %c0_9 = arith.constant 0 : index
    %c0_10 = arith.constant 0 : index
    %25 = vector.load %arg3[%c0_8, %c0_9, %c0_10] : memref<1x4x128xf32, #tpu.memory_space<vmem>>, vector<1x4x128xf32>
    %26 = vector.shape_cast %25 : vector<1x4x128xf32> to vector<4x128xf32>
    %27 = vector.shape_cast %24 : vector<4x128xf32> to vector<1x4x128xf32>
    tpu.vector_store %arg3[%c0_8, %c0_9, %c0_10], %27 {strides = array<i32>} : memref<1x4x128xf32, #tpu.memory_space<vmem>>, vector<1x4x128xf32>,
    return
  }
  func.func @transform_0(%arg0: i32, %arg1: i32) -> (i32, i32, i32) {
    %c0_i32 = arith.constant 0 : i32
    %c0_i32_0 = arith.constant 0 : i32
    return %arg0, %c0_i32, %arg1 : i32, i32, i32
  }
  func.func @transform_1(%arg0: i32, %arg1: i32) -> (i32, i32, i32) {
    %c0_i32 = arith.constant 0 : i32
    %c0_i32_0 = arith.constant 0 : i32
    return %arg0, %c0_i32, %arg1 : i32, i32, i32
  }
}

</mosaic_0001>

<bundles_post_ra>
// kernel: tpu_custom_call.1
= control target key start
LH: loop header
LB: loop body
LE: loop exit
PB: predicated region body
PF: predicated region fallthrough
CT: control target
= control target key end

     0   :  { %6 = vsyncpa [#allocation3], 0  ;;  %s653_s0 = inlined_call_operand.hbm [shape: f32[2,4,16], index: 0, kind: input, shape index: {}]   ;;  %s654_s1 = inlined_call_operand.hbm [shape: f32[2,4,16], index: 1, kind: output, shape index: {}]  }
   0x1   :  { %8 = vsyncpa [#allocation3 + $0x1], 0 }
   0x2   :  { %9 = vsyncpa [#allocation4], 0 }
   0x3   :  { %11 = vsyncpa [#allocation4 + $0x1], 0  ;;  %s477_s6 = smov 0   ;;  %s479_s7 = smov 0  }
   0x4   :  { %s481_s8 = smov 0   ;;  %s483_s9 = smov 0  }
   0x5   :  { %s485_s10 = smov 0   ;;  %s487_s11 = smov 0  }
   0x6 LB: > { %s274_s12 = sadd.s32 4294967295, %s463_s11   ;;  %s275_s13 = sadd.s32 4294967294, %s463_s11   ;;  %s463_s11 = sphi %s487_s11, %s17_s11   ;;  %s459_s10 = sphi %s485_s10, %s670_s10   ;;  %s455_s9 = sphi %s483_s9, %s669_s9   ;;  %s451_s8 = sphi %s481_s8, %s668_s8   ;;  %s447_s7 = sphi %s479_s7, %s667_s7   ;;  %s443_s6 = sphi %s477_s6, %s666_s6  }
   0x7   : > { %s29_s14 = sadd.s32 1, %s459_s10  ;;  %s38_s15 = sadd.s32 1, %s451_s8 }
   0x8   : > { %p31_p0 = scmp.ge.s32.totalorder %s29_s14, 2  ;;  %p45_p1 = scmp.ne.s32.totalorder %s451_s8, %s447_s7 }
   0x9   : > { %p46_p2 = scmp.eq.s32.totalorder %s463_s11, 0  ;;  %p51_p3 = scmp.ne.s32.totalorder %s447_s7, %s443_s6 }
   0xa   : > { %s672_s14 = smov (%p31_p0, %s29_s14), 0  ;;  %p52_p5 = scmp.eq.s32.totalorder %s274_s12, 0 }
   0xb   : > { %p518_p4 = por %p46_p2, %p45_p1  ;;  %s33_s17 = ssub.s32 %s459_s10, %s672_s14 }
   0xc   : > { %p77_p6 = scmp.eq.s32.totalorder %s274_s12, 1  ;;  %p36_p7 = scmp.eq.s32.totalorder %s33_s17, 0 }
   0xd   : > { %p524_p8 = por %p52_p5, %p51_p3  ;;  %p83_p10 = scmp.eq.s32.totalorder %s275_s13, 1 }
   0xe   : > { %p528_p9 = por %p77_p6, %p45_p1  ;;  %p299_p13 = scmp.lt.s32.totalorder %s463_s11, 2 }
   0xf   : > { %s533_s20 = scalar_select %p36_p7, %s451_s8, %s38_s15  }
  0x10   : > { %s658_s19 = scalar_select %p528_p9, 1, 0 }
  0x11   : > { %p535_p11 = por %p83_p10, %p51_p3  ;;  %s103_s22 = sand.u32 1, %s451_s8  }
  0x12   : > { %s278_s23 = sshll.u32 %s103_s22, 2  ;;  %s279_s24 = sshll.u32 %s459_s10, 6 }
  0x13   : > { %s659_s21 = scalar_select %p535_p11, 1, 0 }
  0x14   : > { %s546_s27 = scalar_lea.hbm %s653_s0, %s279_s24  ;;  %s107_s28 = scalar_lea.vmem [#allocation2], %s278_s23 }
  0x15   : > { %s115_s29 = sshll.u32 %s107_s28, 4  ;;  %p552_p0 = pnand %p299_p13, %p518_p4  ;;  %s548_s29 = int_to_ptr.vmem [resolvable:$true] %s115_s29 }
  0x16   : > { %s104_s2 = scalar_lea.sflag [#allocation3], %s103_s22  ;;  %s351_s3 = scalar_lea.hbm %s546_s27, 64 }
  0x17   : > { %p352_p3 = scmp.ne.s32.totalorder %s546_s27, %s351_s3  ;;  %p353_p5 = pneg %p552_p0 }
  0x18   : > { %s356_s12 = scalar_lea.hbm %s653_s0, 128  ;;  %p357_p4 = scmp.lt.u32.totalorder %s546_s27, %s653_s0 }
  0x19   : > { %p354_p6 = pnand %p353_p5, %p352_p3  ;;  %p358_p10 = scmp.lt.u32.totalorder %s356_s12, %s351_s3 }
  0x1a   : > { %p360_p12 = scmp.lt.u32.totalorder %s351_s3, %s546_s27 }
  0x1b   : > { %p355_p7 = pneg %p354_p6  ;;  %p359_p13 = por %p358_p10, %p357_p4 }
  0x1d   : > { %p361_p1 = por %p360_p12, %p359_p13 }
  0x1f   : > { %p362_p2 = pnand %p361_p1, %p355_p7 }
  0x21   : > { %365 = shalt.err (!%p362_p2)
}
  0x22   : > { %s366_s16 = scalar_lea.vmem %s548_s29, 64  ;;  %s465_s17 = smov [#allocation2]  }
  0x23   : > { %p367_p3 = scmp.ne.s32.totalorder %s548_s29, %s366_s16  ;;  %s371_s22 = sshll.u32 %s465_s17, 4  ;;  %s372_s22 = int_to_ptr.vmem [resolvable:$false] %s371_s22 }
  0x24   : > { %s373_s23 = scalar_lea.vmem %s372_s22, 128  ;;  %p374_p9 = scmp.lt.s32.totalorder %s548_s29, %s372_s22 }
  0x25   : > { %p369_p6 = pnand %p367_p3, %p353_p5  ;;  %p375_p4 = scmp.lt.s32.totalorder %s373_s23, %s366_s16 }
  0x27   : > { %p370_p11 = pneg %p369_p6  ;;  %p376_p10 = por %p375_p4, %p374_p9 }
  0x29   : > { %p377_p12 = pnand %p376_p10, %p370_p11 }
  0x2b   : > { %380 = shalt.err (!%p377_p12)
}
  0x2c   : > { %294 = dma.hbm_to_vmem [thread:$0]  (!%p552_p0), %s546_s27, 64, %s548_s29, %s104_s2  }
  0x2d   : > { %p661_p1 = scmp.lt.s32.totalorder %s463_s11, 3  ;;  %p662_p2 = scmp.ge.s32.totalorder %s463_s11, 1 }
  0x2f   : > { %p121_p5 = pnand %p662_p2, %p661_p1 }
  0x30   : > { %s588_s24 = sand.u32 (!%p121_p5), 1, %s447_s7  }
  0x31   : > { %124 = sbr.rel (%p121_p5) target bundleno = 110 (0x6e), region = 24  ;;  %s281_s25 = sshll.u32 (!%p121_p5), %s588_s24, 2 }
  0x32   : > { %s127_s26 = scalar_lea.sflag (!%p121_p5), [#allocation3], %s588_s24  ;;  %s130_s28 = scalar_lea.vmem (!%p121_p5), [#allocation2], %s281_s25 }
  0x38   : > { %434 = dma.done.wait (%p524_p8), %s127_s26, 64  }
  0x39   : > { %436 = vsyncadd (%p524_p8), %s127_s26, 4294967232  ;;  %vm150_vm0 = vcmask 1043456   ;;  %v149_v0 = vld [vmem:[%s130_s28] sm:$0xf]  ;;  %s148_s18 = scalar_lea.vmem [#allocation5], %s281_s25  ;;  %s284_s29 = sshll.u32 %s455_s9, 6 }
  0x3a   : > { %v151_v1 = vsel %vm150_vm0, %v149_v0, 0.0  ;;  %v160_v2 = vmul.f32 %v149_v0, %v149_v0  ;;  %s194_s27 = sshll.u32 %s148_s18, 4  ;;  %s606_s3 = scalar_lea.hbm %s654_s1, %s284_s29  ;;  %s601_s27 = int_to_ptr.vmem [resolvable:$true] %s194_s27 }
  0x3b   : > { %v152_v3 = vrot.slane %v151_v1, 4  ;;  %s180_s4 = scalar_lea.sflag [#allocation4], %s588_s24  ;;  %s381_s5 = scalar_lea.vmem %s601_s27, 64 }
  0x3c   : > { %v161_v4 = vsel %vm150_vm0, %v160_v2, 0.0  ;;  %p382_p8 = scmp.ne.s32.totalorder %s601_s27, %s381_s5  ;;  %p663_p9 = scmp.ne.s32.totalorder %s658_s19, 0 }
  0x3d   : > { %v153_v5 = vadd.f32 %v152_v3, %v151_v1  ;;  %v162_v6 = vrot.slane %v161_v4, 4  ;;  %s466_s9 = smov [#allocation5]  }
  0x3e   : > { %p383_p11 = pnand %p382_p8, %p663_p9  ;;  %s385_s12 = sshll.u32 %s466_s9, 4  ;;  %s386_s12 = int_to_ptr.vmem [resolvable:$false] %s385_s12 }
  0x3f   : > { %v154_v7 = vrot.slane %v153_v5, 2  ;;  %v163_v8 = vadd.f32 %v162_v6, %v161_v4  ;;  %s387_s13 = scalar_lea.vmem %s386_s12, 128  ;;  %p388_p7 = scmp.lt.s32.totalorder %s601_s27, %s386_s12 }
  0x40   : > { %p384_p0 = pneg %p383_p11  ;;  %p389_p13 = scmp.lt.s32.totalorder %s387_s13, %s381_s5 }
  0x41   : > { %v155_v9 = vadd.f32 %v154_v7, %v153_v5  ;;  %v164_v10 = vrot.slane %v163_v8, 2 }
  0x42   : > { %p390_p3 = por %p389_p13, %p388_p7 }
  0x43   : > { %v156_v11 = vrot.slane %v155_v9, 1  ;;  %v165_v12 = vadd.f32 %v164_v10, %v163_v8 }
  0x44   : > { %p391_p6 = pnand %p390_p3, %p384_p0 }
  0x45   : > { %v157_v13 = vadd.f32 %v156_v11, %v155_v9  ;;  %v166_v14 = vrot.slane %v165_v12, 1 }
  0x47   : > { %v159_v15 = vmul.f32 0.25, %v157_v13  ;;  %v167_v16 = vadd.f32 %v166_v14, %v165_v12 }
  0x49   : > { %v168_v17 = vmul.f32 0.25, %v167_v16  ;;  %v169_v18 = vmul.f32 %v159_v15, %v159_v15  ;;  %v174_v22 = vsub.f32 0.0, %v159_v15 }
  0x4b   : > { %v170_v19 = vsub.f32 %v168_v17, %v169_v18 }
  0x4d   : > { %v171_v20 = vmax.f32 %v170_v19, 0.0 }
  0x4f   : > { %v172_v21 = vadd.f32 1e-05, %v171_v20 }
  0x51   : > { %349 = vrsqrt.f32 %v172_v21 }
  0x5b   : > { %v350_v23 = vpop.eup %349 }
  0x5c   : > { %v175_v24 = vmul.f32 %v350_v23, %v174_v22  ;;  %v176_v25 = vmul.f32 %v350_v23, %v149_v0 }
  0x5e   : > { %v177_v26 = vadd.f32 %v176_v25, %v175_v24 }
  0x60   : > { %178 = vst [vmem:[%s148_s18] sm:$0xf] %v177_v26 }
  0x61   : > { %394 = shalt.err (!%p391_p6)
}
  0x62   : > { %s395_s15 = scalar_lea.hbm %s606_s3, 64  ;;  %s399_s22 = scalar_lea.hbm %s654_s1, 128 }
  0x63   : > { %p396_p4 = scmp.ne.s32.totalorder %s606_s3, %s395_s15  ;;  %p400_p1 = scmp.lt.u32.totalorder %s606_s3, %s654_s1 }
  0x64   : > { %p401_p2 = scmp.lt.u32.totalorder %s399_s22, %s395_s15  ;;  %p403_p8 = scmp.lt.u32.totalorder %s395_s15, %s606_s3 }
  0x65   : > { %p397_p10 = pnand %p396_p4, %p663_p9 }
  0x66   : > { %p402_p5 = por %p401_p2, %p400_p1 }
  0x67   : > { %p398_p12 = pneg %p397_p10 }
  0x68   : > { %p404_p11 = por %p403_p8, %p402_p5 }
  0x6a   : > { %p405_p0 = pnand %p404_p11, %p398_p12 }
  0x6c   : > { %408 = shalt.err (!%p405_p0)
}
  0x6d   : > { %289 = dma.vmem_to_hbm [thread:$0]  (%p663_p9), %s601_s27, 64, %s606_s3, %s180_s4  }
  0x6e PF: > { %s206_s25 = sand.u32 1, %s443_s6   ;;  %p664_p7 = scmp.ne.s32.totalorder %s659_s21, 0 }
  0x6f   : > { %p665_p13 = scmp.ge.s32.totalorder %s463_s11, 2  ;;  %s207_s26 = scalar_lea.sflag [#allocation4], %s206_s25 }
  0x71   : > { %p296_p3 = pnand %p665_p13, %p664_p7 }
  0x73   : > { %438 = dma.done.wait (!%p296_p3), %s207_s26, 64  }
  0x74   : > { %440 = vsyncadd (!%p296_p3), %s207_s26, 4294967232  ;;  %s17_s11 = sadd.s32 1, %s463_s11   ;;  %s666_s6 = smov %s447_s7 }
  0x75   : > { %p14_p6 = scmp.ge.s32.totalorder %s17_s11, 4   ;;  %s667_s7 = smov %s451_s8 }
  0x76   : > { %s668_s8 = smov %s533_s20  ;;  %s669_s9 = smov %s459_s10 }
  0x77   : > { %s670_s10 = smov %s672_s14  ;;  %16 = sbr.rel (!%p14_p6) target bundleno = 6 (0x6), region = 69 }
  0x7e   :  { %212 = vsyncpa [#allocation3], 1 }
  0x7f   :  { %214 = vsyncpa [#allocation3 + $0x1], 1 }
  0x80   :  { %215 = vsyncpa [#allocation4], 1 }
  0x81   :  { %217 = vsyncpa [#allocation4 + $0x1], 1 }

</bundles_post_ra>
